<compile_context>
chip_gen: v6e
topology: v6e:2x2x1
jax: 0.10.0
libtpu: 0.0.40
codegen_flags: <defaults>
</compile_context>

<pallas_src>
import numpy as np
import jax
import jax.numpy as jnp
from jax.experimental import pallas as pl
from jax.experimental.pallas import tpu as pltpu

# ----------------------- configuration (matches the module) -------------------
HIDDEN = 32        # tf_hidden_size
MLP_DIM = 64       # tf_mlp_dim
DROP_PROB = 0.0    # tf_drop_prob (identity; dropout only active in training)
B = 2              # batch
SEQ = 64           # sequence length -> rows = B*SEQ = 128 (lane-dense)

_INV_SQRT2 = np.float32(1.0 / np.sqrt(2.0))


# ------------------------------- kernel math ----------------------------------
def _gelu_exact(x):
    # Exact erf GELU — matches PyTorch nn.GELU() default.
    return np.float32(0.5) * x * (np.float32(1.0) + jax.lax.erf(x * _INV_SQRT2))


def mlp_kernel(xt_ref, w1_ref, b1_ref, w2_ref, b2_ref, ot_ref):
    # Transposed problem: rows live on the lane (last) axis.
    #   xt: (HIDDEN, R)     w1: (MLP_DIM, HIDDEN)   b1: (MLP_DIM, 1)
    #   w2: (HIDDEN, MLP_DIM)  b2: (HIDDEN, 1)      ot: (HIDDEN, R)
    xt = xt_ref[...]
    h = jnp.dot(w1_ref[...], xt, preferred_element_type=jnp.float32) + b1_ref[...]
    h = _gelu_exact(h)
    # dropout(p=0) == identity at inference
    yt = jnp.dot(w2_ref[...], h, preferred_element_type=jnp.float32) + b2_ref[...]
    ot_ref[...] = yt


# ------------------------------- wrapper ---------------------------------------
def mlp_forward(x, params):
    """x: (..., HIDDEN) float32. Returns same shape."""
    orig_shape = x.shape
    xm = x.reshape(-1, HIDDEN)          # fold batch+seq into one row axis
    rows = xm.shape[0]
    xt = xm.T                           # (HIDDEN, rows): layout plumbing only

    w1 = params['w1']                   # (MLP_DIM, HIDDEN)  -- PyTorch (out, in)
    b1 = params['b1'].reshape(MLP_DIM, 1)
    w2 = params['w2']                   # (HIDDEN, MLP_DIM)  -- PyTorch (out, in)
    b2 = params['b2'].reshape(HIDDEN, 1)

    vmem = pl.BlockSpec(memory_space=pltpu.MemorySpace.VMEM)
    ot = pl.pallas_call(
        mlp_kernel,
        out_shape=jax.ShapeDtypeStruct((HIDDEN, rows), jnp.float32),
        in_specs=[vmem, vmem, vmem, vmem, vmem],
        out_specs=vmem,
    )(xt, w1, b1, w2, b2)

    return ot.T.reshape(orig_shape)


# --------------------- pure-JAX reference (module semantics) -------------------
def reference_forward(x, params):
    h = x @ params['w1'].T + params['b1']
    h = jax.nn.gelu(h, approximate=False)      # exact erf GELU (PyTorch default)
    return h @ params['w2'].T + params['b2']   # dropout(p=0) == identity


# ----------------------------- parameter init ----------------------------------
def init_params(key):
    """Mimics Mlp._init_weights: xavier_uniform weights, normal(std=1e-6) bias.

    Weights stored in PyTorch's native (out, in) layout.
    """
    k1, k2, k3, k4 = jax.random.split(key, 4)

    def xavier(k, fan_out, fan_in):
        bound = np.sqrt(6.0 / (fan_in + fan_out))
        return jax.random.uniform(k, (fan_out, fan_in), jnp.float32,
                                  minval=-bound, maxval=bound)

    return {
        'w1': xavier(k1, MLP_DIM, HIDDEN),
        'b1': 1e-6 * jax.random.normal(k2, (MLP_DIM,), dtype=jnp.float32),
        'w2': xavier(k3, HIDDEN, MLP_DIM),
        'b2': 1e-6 * jax.random.normal(k4, (HIDDEN,), dtype=jnp.float32),
    }


# ---------------------------------- main ----------------------------------------
if __name__ == "__main__":
    root = jax.random.PRNGKey(0)
    k_x, k_p = jax.random.split(root)
    x = jax.random.normal(k_x, (B, SEQ, HIDDEN), dtype=jnp.float32)
    params = init_params(k_p)

    out = jax.block_until_ready(mlp_forward(x, params))
    assert out.shape == (B, SEQ, HIDDEN)

    with jax.default_matmul_precision("float32"):
        ref = jax.block_until_ready(reference_forward(x, params))

    np.testing.assert_allclose(np.asarray(out), np.asarray(ref),
                               atol=1e-4, rtol=1e-4)
    print("KERNEL_OK")
</pallas_src>

<mosaic_0001>
module attributes {stable_mosaic.version = 11 : i64} {
  func.func @mlp_kernel(%arg0: memref<32x128xf32, #tpu.memory_space<vmem>>, %arg1: memref<64x32xf32, #tpu.memory_space<vmem>>, %arg2: memref<64x1xf32, #tpu.memory_space<vmem>>, %arg3: memref<32x64xf32, #tpu.memory_space<vmem>>, %arg4: memref<32x1xf32, #tpu.memory_space<vmem>>, %arg5: memref<32x128xf32, #tpu.memory_space<vmem>>) attributes {dimension_semantics = [], scalar_prefetch = 0 : i64, scratch_operands = 0 : i64, tpu.core_type = #tpu.core_type<tc>} {
    %c0 = arith.constant 0 : index
    %c0_0 = arith.constant 0 : index
    %0 = vector.load %arg0[%c0, %c0_0] : memref<32x128xf32, #tpu.memory_space<vmem>>, vector<32x128xf32>
    %c0_1 = arith.constant 0 : index
    %c0_2 = arith.constant 0 : index
    %1 = vector.load %arg1[%c0_1, %c0_2] : memref<64x32xf32, #tpu.memory_space<vmem>>, vector<64x32xf32>
    %cst = arith.constant dense<0.000000e+00> : vector<64x128xf32>
    %2 = tpu.matmul %1, %0, %cst {dimension_numbers = #tpu.dot_dimension_numbers<[1], [0], [0], [1], [0, 0, 1, 1], [], []>} : vector<64x32xf32>, vector<32x128xf32>, vector<64x128xf32> -> vector<64x128xf32>
    %c0_3 = arith.constant 0 : index
    %c0_4 = arith.constant 0 : index
    %3 = vector.load %arg2[%c0_3, %c0_4] : memref<64x1xf32, #tpu.memory_space<vmem>>, vector<64x1xf32>
    %4 = vector.broadcast %3 : vector<64x1xf32> to vector<64x128xf32>
    %5 = arith.addf %2, %4 : vector<64x128xf32>
    %cst_5 = arith.constant 5.000000e-01 : f32
    %6 = vector.broadcast %cst_5 : f32 to vector<64x128xf32>
    %7 = arith.mulf %6, %5 : vector<64x128xf32>
    %cst_6 = arith.constant 0.707106769 : f32
    %8 = vector.broadcast %cst_6 : f32 to vector<64x128xf32>
    %9 = arith.mulf %5, %8 : vector<64x128xf32>
    %10 = math.erf %9 : vector<64x128xf32>
    %cst_7 = arith.constant 1.000000e+00 : f32
    %11 = vector.broadcast %cst_7 : f32 to vector<64x128xf32>
    %12 = arith.addf %11, %10 : vector<64x128xf32>
    %13 = arith.mulf %7, %12 : vector<64x128xf32>
    %c0_8 = arith.constant 0 : index
    %c0_9 = arith.constant 0 : index
    %14 = vector.load %arg3[%c0_8, %c0_9] : memref<32x64xf32, #tpu.memory_space<vmem>>, vector<32x64xf32>
    %cst_10 = arith.constant dense<0.000000e+00> : vector<32x128xf32>
    %15 = tpu.matmul %14, %13, %cst_10 {dimension_numbers = #tpu.dot_dimension_numbers<[1], [0], [0], [1], [0, 0, 1, 1], [], []>} : vector<32x64xf32>, vector<64x128xf32>, vector<32x128xf32> -> vector<32x128xf32>
    %c0_11 = arith.constant 0 : index
    %c0_12 = arith.constant 0 : index
    %16 = vector.load %arg4[%c0_11, %c0_12] : memref<32x1xf32, #tpu.memory_space<vmem>>, vector<32x1xf32>
    %17 = vector.broadcast %16 : vector<32x1xf32> to vector<32x128xf32>
    %18 = arith.addf %15, %17 : vector<32x128xf32>
    %c0_13 = arith.constant 0 : index
    %c0_14 = arith.constant 0 : index
    %19 = vector.load %arg5[%c0_13, %c0_14] : memref<32x128xf32, #tpu.memory_space<vmem>>, vector<32x128xf32>
    tpu.vector_store %arg5[%c0_13, %c0_14], %18 {strides = array<i32>} : memref<32x128xf32, #tpu.memory_space<vmem>>, vector<32x128xf32>,
    return
  }
}

</mosaic_0001>

<bundles_post_ra>
// kernel: tpu_custom_call.1
= control target key start
LH: loop header
LB: loop body
LE: loop exit
PB: predicated region body
PF: predicated region fallthrough
CT: control target
= control target key end

     0   :  { %vm81_vm0 = vcmask 261120   ;;  %v519_v3 = vmov 0   ;;  %s652_s0 = inlined_call_operand.vmem [shape: f32[32,128], index: 0, kind: input, shape index: {}]   ;;  %s653_s1 = inlined_call_operand.vmem [shape: f32[64,32], index: 1, kind: input, shape index: {}]   ;;  %s654_s2 = inlined_call_operand.vmem [shape: f32[64,1], index: 2, kind: input, shape index: {}]   ;;  %s655_s3 = inlined_call_operand.vmem [shape: f32[32,64], index: 3, kind: input, shape index: {}]   ;;  %s656_s4 = inlined_call_operand.vmem [shape: f32[32,1], index: 4, kind: input, shape index: {}]   ;;  %s657_s5 = inlined_call_operand.hbm [shape: f32[32,128], index: 5, kind: output, shape index: {}]  }
   0x1   :  { %v24_v0 = vld [vmem:[%s652_s0 + $0x18] sm:$0xff]  ;;  %v23_v1 = vld [vmem:[%s652_s0 + $0x10] sm:$0xff]  ;;  %v25_v2 = vld [vmem:[%s653_s1] sm:$0xff]  ;;  %479 = vset.pattern.permute.xlu0 %v519_v3  ;;  %480 = vset.pattern.permute.xlu1 %v519_v3 }
   0x2   :  { %433 = vmatprep.subr.mxu0 %v24_v0  ;;  %v22_v4 = vld [vmem:[%s652_s0 + $0x8] sm:$0xff]  ;;  %441 = vmatprep.mubr.msk.f32.mxu0 %vm81_vm0, %v25_v2  ;;  %v21_v5 = vld [vmem:[%s652_s0] sm:$0xff]  ;;  %v40_v6 = vld [vmem:[%s654_s2 + $0x38] sm:$0xff] }
   0x3   :  { %434 = vmatpush3.msra.mxu0 %v24_v0  ;;  %v38_v7 = vld [vmem:[%s654_s2 + $0x28] sm:$0xff]  ;;  %78 = vperm.xlu0 %479, %v40_v6   ;;  %v39_v9 = vld [vmem:[%s654_s2 + $0x30] sm:$0xff]  ;;  %v37_v11 = vld [vmem:[%s654_s2 + $0x20] sm:$0xff] }
   0x4   :  { %435 = vmatprep.subr.mxu0 %v23_v1  ;;  %v26_v8 = vld [vmem:[%s653_s1 + $0x8] sm:$0xff]  ;;  %68 = vperm.xlu1 %480, %v38_v7   ;;  %v27_v10 = vld [vmem:[%s653_s1 + $0x10] sm:$0xff] }
   0x5   :  { %436 = vmatpush3.msra.mxu0 %v23_v1 }
   0x6   :  { %437 = vmatprep.subr.mxu0 %v22_v4 }
   0x7   :  { %438 = vmatpush3.msra.mxu0 %v22_v4 }
   0x8   :  { %439 = vmatprep.subr.mxu0 %v21_v5 }
   0x9   :  { %440 = vmatpush3.msra.mxu0 %v21_v5 }
   0xa   :  { %10 = vsyncpa [#allocation3], 0  ;;  %442 = vmatmul.mubr.msk.f32.vlgmr.msra.gmra.mxu0 %vm81_vm0, %v26_v8  ;;  %73 = vperm.xlu0 %479, %v39_v9   ;;  %v28_v12 = vld [vmem:[%s653_s1 + $0x18] sm:$0xff]  ;;  %v29_v14 = vld [vmem:[%s653_s1 + $0x20] sm:$0xff]  ;;  %vm279_vm1 = vcmask 523264   ;;  %s520_s19 = smov [#allocation2]  }
   0xb   :  { %444 = vmatprep.mubr.msk.f32.mxu0 %vm81_vm0, %v27_v10  ;;  %63 = vperm.xlu1 %480, %v37_v11   ;;  %v36_v13 = vld [vmem:[%s654_s2 + $0x18] sm:$0xff]  ;;  %v35_v15 = vld [vmem:[%s654_s2 + $0x10] sm:$0xff]  ;;  %v30_v16 = vld [vmem:[%s653_s1 + $0x28] sm:$0xff]  ;;  %s386_s20 = sshll.u32 %s520_s19, 4  ;;  %s387_s20 = int_to_ptr.vmem [resolvable:$true] %s386_s20 }
   0xc   :  { %v34_v17 = vld [vmem:[%s654_s2 + $0x8] sm:$0xff]  ;;  %v31_v18 = vld [vmem:[%s653_s1 + $0x30] sm:$0xff]  ;;  %v33_v19 = vld [vmem:[%s654_s2] sm:$0xff]  ;;  %p502_p1 = scmp.lt.s32.totalorder %s387_s20, %s387_s20 }
   0xd   :  { %v32_v20 = vld [vmem:[%s653_s1 + $0x38] sm:$0xff]  ;;  %v255_v21 = vld [vmem:[%s656_s4] sm:$0xff]  ;;  %v256_v22 = vld [vmem:[%s656_s4 + $0x8] sm:$0xff] }
   0xe   :  { %445 = vmatmul.mubr.msk.f32.gmra.mxu0 %vm81_vm0, %v28_v12  ;;  %58 = vperm.xlu0 %479, %v36_v13   ;;  %v257_v23 = vld [vmem:[%s656_s4 + $0x10] sm:$0xff]  ;;  %v258_v24 = vld [vmem:[%s656_s4 + $0x18] sm:$0xff]  ;;  %v251_v25 = vld [vmem:[%s655_s3] sm:$0xff] }
   0xf   :  { %447 = vmatprep.mubr.msk.f32.mxu0 %vm81_vm0, %v29_v14  ;;  %53 = vperm.xlu1 %480, %v35_v15  }
  0x10   :  { %469 = vmatprep.mubr.msk.f32.mxu1 %vm279_vm1, %v251_v25 }
  0x12   :  { %448 = vmatmul.mubr.msk.f32.gmra.mxu0 %vm81_vm0, %v30_v16  ;;  %48 = vperm.xlu0 %479, %v34_v17  }
  0x13   :  { %450 = vmatprep.mubr.msk.f32.mxu0 %vm81_vm0, %v31_v18  ;;  %43 = vperm.xlu1 %480, %v33_v19  }
  0x16   :  { %451 = vmatmul.mubr.msk.f32.gmra.mxu0 %vm81_vm0, %v32_v20  ;;  %261 = vperm.xlu0 %479, %v255_v21  }
  0x17   :  { %266 = vperm.xlu1 %480, %v256_v22  }
  0x1a   :  { %271 = vperm.xlu0 %479, %v257_v23  }
  0x1b   :  { %276 = vperm.xlu1 %480, %v258_v24  }
  0x7e   :  { %v79_v26 = vpop.permute.xlu0 %78 }
  0x7f   :  { %v69_v27 = vpop.permute.xlu1 %68 }
  0x85   :  { %v74_v29 = vpop.permute.xlu0 %73 }
  0x86   :  { %v64_v31 = vpop.permute.xlu1 %63 }
  0x89   :  { %v59_v34 = vpop.permute.xlu0 %58 }
  0x8a   :  { %v54_v37 = vpop.permute.xlu1 %53 }
  0x8d   :  { %v49_v44 = vpop.permute.xlu0 %48 }
  0x8e   :  { %v44_v50 = vpop.permute.xlu1 %43 }
  0xca   :  { %v443_v28 = vpop.f32.mrf.mxu0 }
  0xcb   :  { %v178_v51 = vadd.f32 %v443_v28, %v49_v44  ;;  %v254_v28 = vld [vmem:[%s655_s3 + $0x18] sm:$0xff] }
  0xcc   :  { %v172_v30 = vpop.f32.mrf.mxu0 }
  0xcd   :  { %v173_v54 = vadd.f32 %v172_v30, %v44_v50  ;;  %v220_v56 = vmul.f32 0.70710677, %v178_v51  ;;  %v212_v20 = vmul.f32 0.5, %v178_v51  ;;  %v262_v30 = vpop.permute.xlu0 %261 }
  0xce   :  { %v446_v32 = vpop.f32.mrf.mxu0 }
  0xcf   :  { %v188_v42 = vadd.f32 %v446_v32, %v59_v34  ;;  %v219_v57 = vmul.f32 0.70710677, %v173_v54  ;;  %v211_v23 = vmul.f32 0.5, %v173_v54 }
  0xd0   :  { %v182_v33 = vpop.f32.mrf.mxu0 }
  0xd1   :  { %v183_v47 = vadd.f32 %v182_v33, %v54_v37  ;;  %v222_v52 = vmul.f32 0.70710677, %v188_v42  ;;  %v214_v13 = vmul.f32 0.5, %v188_v42 }
  0xd2   :  { %v449_v35 = vpop.f32.mrf.mxu0 }
  0xd3   :  { %v198_v36 = vadd.f32 %v449_v35, %v69_v27  ;;  %v221_v55 = vmul.f32 0.70710677, %v183_v47  ;;  %v213_v17 = vmul.f32 0.5, %v183_v47  ;;  %v253_v27 = vld [vmem:[%s655_s3 + $0x10] sm:$0xff] }
  0xd4   :  { %v192_v38 = vpop.f32.mrf.mxu0 }
  0xd5   :  { %v193_v39 = vadd.f32 %v192_v38, %v64_v31  ;;  %v224_v40 = vmul.f32 0.70710677, %v198_v36  ;;  %v216_v5 = vmul.f32 0.5, %v198_v36  ;;  %v272_v38 = vpop.permute.xlu0 %271 }
  0xd6   :  { %v452_v41 = vpop.f32.mrf.mxu0 }
  0xd7   :  { %v208_v43 = vadd.f32 %v452_v41, %v79_v26  ;;  %v223_v45 = vmul.f32 0.70710677, %v193_v39  ;;  %481 = verf.f32 %v224_v40  ;;  %v215_v9 = vmul.f32 0.5, %v193_v39  ;;  %v252_v26 = vld [vmem:[%s655_s3 + $0x8] sm:$0xff]  ;;  %s497_s3 = scalar_lea.vmem %s387_s20, 512 }
  0xd8   :  { %v202_v46 = vpop.f32.mrf.mxu0  ;;  %p498_p0 = scmp.ne.s32.totalorder %s387_s20, %s497_s3  ;;  %p503_p2 = scmp.lt.s32.totalorder %s497_s3, %s497_s3 }
  0xd9   :  { %v226_v48 = vmul.f32 0.70710677, %v208_v43  ;;  %v203_v49 = vadd.f32 %v202_v46, %v74_v29  ;;  %v218_v61 = vmul.f32 0.5, %v208_v43  ;;  %v267_v29 = vpop.permute.xlu1 %266 }
  0xda   :  { %p504_p3 = por %p503_p2, %p502_p1 }
  0xdb   :  { %483 = verf.f32 %v226_v48  ;;  %v225_v53 = vmul.f32 0.70710677, %v203_v49  ;;  %v217_v0 = vmul.f32 0.5, %v203_v49 }
  0xdc   :  { %485 = verf.f32 %v223_v45  ;;  %p505_p4 = pnand %p504_p3, %p498_p0 }
  0xdd   :  { %487 = verf.f32 %v225_v53  ;;  %v277_v35 = vpop.permute.xlu1 %276 }
  0xde   :  { %489 = verf.f32 %v222_v52 }
  0xdf   :  { %491 = verf.f32 %v221_v55 }
  0xe0   :  { %493 = verf.f32 %v220_v56 }
  0xe1   :  { %495 = verf.f32 %v219_v57 }
  0xe4   :  { %v482_v58 = vpop.eup %481 }
  0xe5   :  { %v240_v3 = vadd.f32 1.0, %v482_v58 }
  0xe7   :  { %v248_v10 = vmul.f32 %v240_v3, %v216_v5 }
  0xe8   :  { %v484_v59 = vpop.eup %483 }
  0xe9   :  { %v486_v60 = vpop.eup %485  ;;  %v242_v62 = vadd.f32 1.0, %v484_v59 }
  0xea   :  { %v488_v63 = vpop.eup %487  ;;  %v239_v7 = vadd.f32 1.0, %v486_v60 }
  0xeb   :  { %v250_v1 = vmul.f32 %v242_v62, %v218_v61  ;;  %v241_v2 = vadd.f32 1.0, %v488_v63  ;;  %v490_v4 = vpop.eup %489 }
  0xec   :  { %v492_v8 = vpop.eup %491  ;;  %v238_v11 = vadd.f32 1.0, %v490_v4  ;;  %v247_v14 = vmul.f32 %v239_v7, %v215_v9 }
  0xed   :  { %453 = vmatprep.subr.mxu1 %v250_v1  ;;  %v249_v6 = vmul.f32 %v241_v2, %v217_v0  ;;  %v494_v12 = vpop.eup %493  ;;  %v237_v15 = vadd.f32 1.0, %v492_v8 }
  0xee   :  { %454 = vmatpush3.msra.mxu1 %v250_v1  ;;  %v496_v16 = vpop.eup %495  ;;  %v246_v18 = vmul.f32 %v238_v11, %v214_v13  ;;  %v236_v19 = vadd.f32 1.0, %v494_v12 }
  0xef   :  { %455 = vmatprep.subr.mxu1 %v249_v6  ;;  %v245_v21 = vmul.f32 %v237_v15, %v213_v17  ;;  %v235_v22 = vadd.f32 1.0, %v496_v16 }
  0xf0   :  { %456 = vmatpush3.msra.mxu1 %v249_v6  ;;  %v244_v24 = vmul.f32 %v236_v19, %v212_v20 }
  0xf1   :  { %457 = vmatprep.subr.mxu1 %v248_v10  ;;  %v243_v25 = vmul.f32 %v235_v22, %v211_v23 }
  0xf2   :  { %458 = vmatpush3.msra.mxu1 %v248_v10 }
  0xf3   :  { %459 = vmatprep.subr.mxu1 %v247_v14 }
  0xf4   :  { %460 = vmatpush3.msra.mxu1 %v247_v14 }
  0xf5   :  { %461 = vmatprep.subr.mxu1 %v246_v18 }
  0xf6   :  { %462 = vmatpush3.msra.mxu1 %v246_v18 }
  0xf7   :  { %463 = vmatprep.subr.mxu1 %v245_v21 }
  0xf8   :  { %464 = vmatpush3.msra.mxu1 %v245_v21 }
  0xf9   :  { %465 = vmatprep.subr.mxu1 %v244_v24 }
  0xfa   :  { %466 = vmatpush3.msra.mxu1 %v244_v24 }
  0xfb   :  { %467 = vmatprep.subr.mxu1 %v243_v25 }
  0xfc   :  { %468 = vmatpush3.msra.mxu1 %v243_v25 }
  0xfd   :  { %470 = vmatmul.mubr.msk.f32.vlgmr.msra.gmra.mxu1 %vm279_vm1, %v252_v26 }
  0xfe   :  { %472 = vmatprep.mubr.msk.f32.mxu1 %vm279_vm1, %v253_v27 }
 0x101   :  { %473 = vmatmul.mubr.msk.f32.gmra.mxu1 %vm279_vm1, %v254_v28 }
 0x1bd   :  { %v471_v31 = vpop.f32.mrf.mxu1 }
 0x1be   :  { %v364_v32 = vadd.f32 %v471_v31, %v267_v29 }
 0x1bf   :  { %v358_v33 = vpop.f32.mrf.mxu1 }
 0x1c0   :  { %378 = vst [vmem:[#allocation2 + $0x8] sm:$0xff] %v364_v32  ;;  %v359_v34 = vadd.f32 %v358_v33, %v262_v30 }
 0x1c1   :  { %v474_v36 = vpop.f32.mrf.mxu1 }
 0x1c2   :  { %377 = vst [vmem:[#allocation2] sm:$0xff] %v359_v34  ;;  %v374_v37 = vadd.f32 %v474_v36, %v277_v35 }
 0x1c3   :  { %v368_v39 = vpop.f32.mrf.mxu1 }
 0x1c4   :  { %380 = vst [vmem:[#allocation2 + $0x18] sm:$0xff] %v374_v37  ;;  %v369_v40 = vadd.f32 %v368_v39, %v272_v38 }
 0x1c6   :  { %379 = vst [vmem:[#allocation2 + $0x10] sm:$0xff] %v369_v40 }
 0x1c7   :  { %508 = shalt.err (!%p505_p4)
}
 0x1c8   :  { %s521_s21 = smov 128   ;;  %s522_s22 = smov 8  }
 0x1c9   :  { %392 = dma.vmem_to_hbm [thread:$0]  %s387_s20, 512, %s657_s5, [#allocation3], %s521_s21, %s521_s21, %s522_s22  }
 0x1ca   :  { %517 = dma.done.wait [#allocation3], 512  }
 0x1cb   :  { %518 = vsyncadd [#allocation3], 4294966784 }
 0x1cc   :  { %396 = vsyncpa [#allocation3], 1 }

</bundles_post_ra>
